<compile_context>
chip_gen: v7x
topology: tpu7x:2x2x1
jax: 0.10.0
libtpu: 0.0.40
codegen_flags: <defaults>
</compile_context>

<pallas_src>
import jax
import jax.numpy as jnp
from jax.experimental import pallas as pl
from jax.experimental.pallas import tpu as pltpu


# --------------------------------------------------------------------------- #
# Tile planning
# --------------------------------------------------------------------------- #
_PREFERRED_BLOCKS = (2048, 1024, 512, 256, 128)


def _block_options(n):
    opts = [b for b in _PREFERRED_BLOCKS if n % b == 0]
    return opts if opts else [n]


def _vmem_capacity_bytes():
    try:
        cap = int(getattr(pltpu.get_tpu_info(), "vmem_capacity_bytes", 0))
        if cap > 0:
            return cap
    except Exception:
        pass
    return 64 * 1024 * 1024   # conservative default (v7x per-TensorCore VMEM)


def _working_set_full_cols(n, f_in, o, br):
    a_blk = 2 * br * n * 2                                    # bf16 A slab, 2 buffers
    resident = 2 * n * (2 * f_in) * 2 + 2 * n * (2 * o) * 4   # Xcat bf16, Gcat f32
    out_blk = 2 * 2 * br * (2 * o) * 4                        # Gcat / Zcat out blocks
    return a_blk + resident + out_blk + (2 << 20)


def _working_set_tiled(n, f_in, o, br, bc):
    a_blk = 2 * br * bc * 2
    resident = 2 * n * (2 * f_in) * 2 + 2 * n * (2 * o) * 4
    acc = br * 2 * max(f_in, o) * 4
    out_blk = 2 * 2 * br * (2 * o) * 4
    return a_blk + resident + acc + out_blk + (2 << 20)


def _plan_blocks(n, f_in, o, budget, block_rows=None, block_cols=None):
    row_opts = _block_options(n)
    # Keep >= 2 row blocks when possible so the 'parallel' axis feeds both v7x TCs.
    pref_rows = [b for b in row_opts if n // b >= 2] or row_opts
    if block_rows is None:
        fits = [b for b in pref_rows
                if _working_set_full_cols(n, f_in, o, b) <= budget]
        if fits:
            block_rows = fits[0]               # largest full-column-capable row block
        else:
            fits = [b for b in pref_rows
                    if _working_set_tiled(n, f_in, o, b, row_opts[-1]) <= budget]
            block_rows = fits[0] if fits else pref_rows[-1]
    if block_cols is None:
        if _working_set_full_cols(n, f_in, o, block_rows) <= budget:
            block_cols = n                     # stream full A row slabs: no k axis
        else:
            col_opts = _block_options(n)
            fits = [b for b in col_opts
                    if _working_set_tiled(n, f_in, o, block_rows, b) <= budget]
            block_cols = fits[0] if fits else col_opts[-1]
    return block_rows, block_cols


# --------------------------------------------------------------------------- #
# Shared epilogue: (rows, 2F) f32 -> (rows, 2O) f32, per lane half (no zero
# blocks of a block-diagonal weight), layer-2 weight applied BEFORE the 2nd A
# pass (reassociation: O < H shrinks the N^2 contraction width).
# --------------------------------------------------------------------------- #
def _gcn_epilogue(ax_f32, w1, b1, w2):
    f = w1.shape[0]
    h_r = jnp.dot(ax_f32[:, :f], w1, preferred_element_type=jnp.float32) + b1
    h_c = jnp.dot(ax_f32[:, f:], w1, preferred_element_type=jnp.float32) + b1
    g_r = jnp.dot(h_r, w2, preferred_element_type=jnp.float32)
    g_c = jnp.dot(h_c, w2, preferred_element_type=jnp.float32)
    return jnp.concatenate([g_r, g_c], axis=-1)


# --------------------------------------------------------------------------- #
# Kernel A: Gcat[i] = ((A[i, :] @ Xcat) @ W1 + b1) @ W2      (per lane half)
# --------------------------------------------------------------------------- #
def _layer1_full_kernel(a_ref, xcat_ref, w1_ref, b1_ref, w2_ref, gcat_ref):
    ax = jnp.dot(a_ref[...], xcat_ref[...], preferred_element_type=jnp.float32)
    gcat_ref[...] = _gcn_epilogue(ax, w1_ref[...], b1_ref[...], w2_ref[...])


def _layer1_tiled_kernel(a_ref, xcat_ref, w1_ref, b1_ref, w2_ref, gcat_ref, acc_ref):
    k = pl.program_id(1)
    bc = a_ref.shape[1]

    @pl.when(k == 0)
    def _():
        acc_ref[...] = jnp.zeros_like(acc_ref)

    start = pl.multiple_of(k * bc, bc)
    acc_ref[...] += jnp.dot(a_ref[...], xcat_ref[pl.ds(start, bc), :],
                            preferred_element_type=jnp.float32)

    @pl.when(k == pl.num_programs(1) - 1)
    def _():
        gcat_ref[...] = _gcn_epilogue(acc_ref[...], w1_ref[...], b1_ref[...],
                                      w2_ref[...])


# --------------------------------------------------------------------------- #
# Kernel B: Zcat[i] = A[i, :] @ Gcat + b2cat
# --------------------------------------------------------------------------- #
def _layer2_full_kernel(a_ref, gcat_ref, b2cat_ref, zcat_ref):
    zcat_ref[...] = (jnp.dot(a_ref[...], gcat_ref[...],
                             preferred_element_type=jnp.float32) + b2cat_ref[...])


def _layer2_tiled_kernel(a_ref, gcat_ref, b2cat_ref, zcat_ref, acc_ref):
    k = pl.program_id(1)
    bc = a_ref.shape[1]

    @pl.when(k == 0)
    def _():
        acc_ref[...] = jnp.zeros_like(acc_ref)

    start = pl.multiple_of(k * bc, bc)
    acc_ref[...] += jnp.dot(a_ref[...], gcat_ref[pl.ds(start, bc), :],
                            preferred_element_type=jnp.float32)

    @pl.when(k == pl.num_programs(1) - 1)
    def _():
        zcat_ref[...] = acc_ref[...] + b2cat_ref[...]


# --------------------------------------------------------------------------- #
# Kernel C1: column sum of z_real (feeds the sigmoid-mean readout).
# --------------------------------------------------------------------------- #
def _colsum_kernel(zcat_ref, csum_ref):
    @pl.when(pl.program_id(0) == 0)
    def _():
        csum_ref[...] = jnp.zeros_like(csum_ref)

    o = csum_ref.shape[1]
    csum_ref[...] += jnp.sum(zcat_ref[...][:, :o], axis=0, keepdims=True)


def _stable_softplus(x):
    # softplus(x) = log(1 + exp(x)), stable for large |x|.
    return jnp.maximum(x, 0.0) + jnp.log(1.0 + jnp.exp(-jnp.abs(x)))


# --------------------------------------------------------------------------- #
# Wrapper
# --------------------------------------------------------------------------- #
def inspectionl_forward(a_norm, x, x_corrupted, w1, b1, w2, b2, wd,
                        *, block_rows=None, block_cols=None):
    """Full InspectionL forward (scalar loss) via four Pallas TPU kernels."""
    n, f_in = x.shape
    h = w1.shape[1]
    o = w2.shape[1]

    vmem_cap = _vmem_capacity_bytes()
    vmem_limit = int(vmem_cap * 0.75)
    plan_budget = int(vmem_cap * 0.60)
    block_rows, block_cols = _plan_blocks(n, f_in, o, plan_budget,
                                          block_rows, block_cols)
    assert n % block_rows == 0 and n % block_cols == 0

    # A_hat should already be bf16 (build it that way: no standalone N^2 cast).
    a_bf16 = a_norm if a_norm.dtype == jnp.bfloat16 else a_norm.astype(jnp.bfloat16)

    # Real + corrupted features stacked along the lane axis -> one A pass/layer.
    # TODO(synk): for large F, gather the permuted rows in-kernel via a
    # scalar-prefetched permutation instead of materializing a second copy.
    xcat = jnp.concatenate([x, x_corrupted], axis=-1).astype(jnp.bfloat16)

    w1f = w1.astype(jnp.float32)
    b1f = b1.reshape(1, h).astype(jnp.float32)
    w2f = w2.astype(jnp.float32)
    b2cat = jnp.concatenate([b2, b2]).reshape(1, 2 * o).astype(jnp.float32)
    wdT = wd.T.astype(jnp.float32)

    nb_rows = n // block_rows
    full_cols = (block_cols == n)

    # TODO(synk): pad 2*O up to 128 lanes so the Gcat/Zcat writebacks use
    # unmasked full-lane stores (small, nearly-free win; skipped for clarity).

    if full_cols:
        # ---- no reduction axis: each step streams a full (block_rows, N) slab.
        grid = (nb_rows,)
        params = pltpu.CompilerParams(dimension_semantics=("parallel",),
                                      vmem_limit_bytes=vmem_limit)
        a_spec = pl.BlockSpec((block_rows, n), lambda i: (i, 0))

        gcat = pl.pallas_call(
            _layer1_full_kernel,
            out_shape=jax.ShapeDtypeStruct((n, 2 * o), jnp.float32),
            grid=grid,
            in_specs=[a_spec,
                      pl.BlockSpec((n, 2 * f_in), lambda i: (0, 0)),
                      pl.BlockSpec((f_in, h), lambda i: (0, 0)),
                      pl.BlockSpec((1, h), lambda i: (0, 0)),
                      pl.BlockSpec((h, o), lambda i: (0, 0))],
            out_specs=pl.BlockSpec((block_rows, 2 * o), lambda i: (i, 0)),
            compiler_params=params,
        )(a_bf16, xcat, w1f, b1f, w2f)

        zcat = pl.pallas_call(
            _layer2_full_kernel,
            out_shape=jax.ShapeDtypeStruct((n, 2 * o), jnp.float32),
            grid=grid,
            in_specs=[a_spec,
                      pl.BlockSpec((n, 2 * o), lambda i: (0, 0)),
                      pl.BlockSpec((1, 2 * o), lambda i: (0, 0))],
            out_specs=pl.BlockSpec((block_rows, 2 * o), lambda i: (i, 0)),
            compiler_params=params,
        )(a_bf16, gcat, b2cat)
    else:
        # ---- column-tiled fallback: reduction axis + f32 VMEM accumulator.
        grid = (nb_rows, n // block_cols)
        params = pltpu.CompilerParams(
            dimension_semantics=("parallel", "arbitrary"),
            vmem_limit_bytes=vmem_limit)
        a_spec = pl.BlockSpec((block_rows, block_cols), lambda i, k: (i, k))

        gcat = pl.pallas_call(
            _layer1_tiled_kernel,
            out_shape=jax.ShapeDtypeStruct((n, 2 * o), jnp.float32),
            grid=grid,
            in_specs=[a_spec,
                      pl.BlockSpec((n, 2 * f_in), lambda i, k: (0, 0)),
                      pl.BlockSpec((f_in, h), lambda i, k: (0, 0)),
                      pl.BlockSpec((1, h), lambda i, k: (0, 0)),
                      pl.BlockSpec((h, o), lambda i, k: (0, 0))],
            out_specs=pl.BlockSpec((block_rows, 2 * o), lambda i, k: (i, 0)),
            scratch_shapes=[pltpu.VMEM((block_rows, 2 * f_in), jnp.float32)],
            compiler_params=params,
        )(a_bf16, xcat, w1f, b1f, w2f)

        zcat = pl.pallas_call(
            _layer2_tiled_kernel,
            out_shape=jax.ShapeDtypeStruct((n, 2 * o), jnp.float32),
            grid=grid,
            in_specs=[a_spec,
                      pl.BlockSpec((n, 2 * o), lambda i, k: (0, 0)),
                      pl.BlockSpec((1, 2 * o), lambda i, k: (0, 0))],
            out_specs=pl.BlockSpec((block_rows, 2 * o), lambda i, k: (i, 0)),
            scratch_shapes=[pltpu.VMEM((block_rows, 2 * o), jnp.float32)],
            compiler_params=params,
        )(a_bf16, gcat, b2cat)

    # ---- readout + discriminator + BCE over the small (N, 2O) embeddings. ----
    loss_params = pltpu.CompilerParams(dimension_semantics=("arbitrary",),
                                       vmem_limit_bytes=vmem_limit)
    loss_grid = (nb_rows,)

    csum = pl.pallas_call(
        _colsum_kernel,
        out_shape=jax.ShapeDtypeStruct((1, o), jnp.float32),
        grid=loss_grid,
        in_specs=[pl.BlockSpec((block_rows, 2 * o), lambda i: (i, 0))],
        out_specs=pl.BlockSpec((1, o), lambda i: (0, 0)),
        compiler_params=loss_params,
    )(zcat)

    inv_n = 1.0 / float(n)
    inv_2n = 1.0 / (2.0 * float(n))

    def _loss_kernel(zcat_ref, csum_ref, wdT_ref, loss_ref):
        @pl.when(pl.program_id(0) == 0)
        def _():
            loss_ref[...] = jnp.zeros_like(loss_ref)

        od = wdT_ref.shape[0]
        zcat_blk = zcat_ref[...]                              # (block_rows, 2O) f32
        z_real = zcat_blk[:, :od]
        z_corr = zcat_blk[:, od:]

        # readout: s = sigmoid(mean(z_real, axis=0)); exact sigmoid (it feeds
        # every discriminator logit, so no approx reciprocal here).
        s = 1.0 / (1.0 + jnp.exp(-csum_ref[...] * inv_n))     # (1, O)

        # v = Wd^T @ s^T kept 2-D; discriminator logits on the MXU.
        v = jnp.sum(wdT_ref[...] * s, axis=1, keepdims=True)  # (O, 1)
        logit_r = jnp.dot(z_real, v, preferred_element_type=jnp.float32)
        logit_c = jnp.dot(z_corr, v, preferred_element_type=jnp.float32)

        # BCE with targets [1]*N ++ [0]*N from logits:
        #   y=1: -log(sigmoid(l)) = softplus(-l); y=0: -log(1-sigmoid(l)) = softplus(l)
        # PyTorch BCELoss clamps each log term at -100 -> clamp loss term at 100.
        term = (jnp.minimum(_stable_softplus(-logit_r), 100.0)
                + jnp.minimum(_stable_softplus(logit_c), 100.0))
        loss_ref[...] += jnp.sum(term, axis=0, keepdims=True) * inv_2n

    loss = pl.pallas_call(
        _loss_kernel,
        out_shape=jax.ShapeDtypeStruct((1, 1), jnp.float32),
        grid=loss_grid,
        in_specs=[pl.BlockSpec((block_rows, 2 * o), lambda i: (i, 0)),
                  pl.BlockSpec((1, o), lambda i: (0, 0)),
                  pl.BlockSpec((o, o), lambda i: (0, 0))],
        out_specs=pl.BlockSpec((1, 1), lambda i: (0, 0)),
        compiler_params=loss_params,
    )(zcat, csum, wdT)
    return loss


def build_normalized_adjacency(edge_index, num_nodes, dtype=jnp.bfloat16):
    """Dense D^-1/2 (A + I) D^-1/2 (PyG gcn_norm, unit edge weights), emitted
    directly in `dtype` so the forward never runs a standalone N^2 cast pass."""
    src, dst = edge_index
    A = jnp.zeros((num_nodes, num_nodes), jnp.float32)
    A = A.at[dst, src].set(1.0)                      # message j -> i lands in row i
    A = A + jnp.eye(num_nodes, dtype=jnp.float32)    # add self loops
    deg = jnp.sum(A, axis=1)
    dinv = jnp.where(deg > 0, 1.0 / jnp.sqrt(deg), 0.0)
    return (dinv[:, None] * A * dinv[None, :]).astype(dtype)


if __name__ == "__main__":
    # Small deterministic problem (N chosen so both the full-column path and the
    # column-tiled fallback are exercised with >= 2 row blocks).
    N = 256         # number of graph nodes
    F_IN = 8        # input_dimension
    H = 32          # hidden_layers
    O = 16          # output_dimension

    key = jax.random.PRNGKey(0)
    k_x, k_perm, k_w1, k_b1, k_w2, k_b2, k_wd = jax.random.split(key, 7)

    # Node features.
    x = jax.random.normal(k_x, (N, F_IN), jnp.float32)

    # Undirected ring graph: i <-> (i+1) mod N (deterministic edge_index).
    idx = jnp.arange(N)
    src = jnp.concatenate([idx, (idx + 1) % N])
    dst = jnp.concatenate([(idx + 1) % N, idx])
    edge_index = jnp.stack([src, dst])
    a_bf16 = build_normalized_adjacency(edge_index, N, dtype=jnp.bfloat16)
    a_f32 = build_normalized_adjacency(edge_index, N, dtype=jnp.float32)  # ref only

    # corrupt(): deterministic permutation of node features.
    perm = jax.random.permutation(k_perm, N)
    x_corrupted = x[perm]

    # Deterministic synthetic parameters (not a checkpoint load).
    w1 = jax.random.normal(k_w1, (F_IN, H), jnp.float32) * (1.0 / jnp.sqrt(F_IN))
    b1 = jax.random.normal(k_b1, (H,), jnp.float32) * 0.01
    w2 = jax.random.normal(k_w2, (H, O), jnp.float32) * (1.0 / jnp.sqrt(H))
    b2 = jax.random.normal(k_b2, (O,), jnp.float32) * 0.01
    wd = jax.random.normal(k_wd, (O, O), jnp.float32) * (1.0 / jnp.sqrt(O))

    # Pure-JAX f32 reference of the same forward pass (sanity check).
    def ref_loss(a, xx, xc):
        def embed(u):
            hh = a @ u @ w1 + b1
            return a @ hh @ w2 + b2
        z_r, z_c = embed(xx), embed(xc)
        s = jax.nn.sigmoid(jnp.mean(z_r, axis=0, keepdims=True))
        p_r = jax.nn.sigmoid((z_r @ wd.T) @ s.T)
        p_c = jax.nn.sigmoid((z_c @ wd.T) @ s.T)
        lr = -jnp.maximum(jnp.log(p_r), -100.0)
        lc = -jnp.maximum(jnp.log(1.0 - p_c), -100.0)
        return (jnp.sum(lr) + jnp.sum(lc)) / (2.0 * xx.shape[0])

    ref = jax.block_until_ready(ref_loss(a_f32, x, x_corrupted))

    # 1) default plan: full-column A slabs (no reduction grid axis, 2 row blocks).
    loss_full = jax.block_until_ready(
        inspectionl_forward(a_bf16, x, x_corrupted, w1, b1, w2, b2, wd))
    # 2) forced column tiling: exercises the reduction-axis fallback path.
    loss_tiled = jax.block_until_ready(
        inspectionl_forward(a_bf16, x, x_corrupted, w1, b1, w2, b2, wd,
                            block_rows=128, block_cols=128))

    for loss in (loss_full, loss_tiled):
        assert loss.shape == (1, 1) and jnp.isfinite(loss).all()
        assert abs(float(loss[0, 0]) - float(ref)) < 5e-2, (float(loss[0, 0]),
                                                            float(ref))
    print("KERNEL_OK")
</pallas_src>

<mosaic_0001>
module attributes {stable_mosaic.version = 11 : i64} {
  func.func @_layer1_full_kernel(%arg0: i32, %arg1: memref<128x256xbf16, #tpu.memory_space<vmem>>, %arg2: memref<256x16xbf16, #tpu.memory_space<vmem>>, %arg3: memref<8x32xf32, #tpu.memory_space<vmem>>, %arg4: memref<1x32xf32, #tpu.memory_space<vmem>>, %arg5: memref<32x16xf32, #tpu.memory_space<vmem>>, %arg6: memref<128x32xf32, #tpu.memory_space<vmem>>) attributes {dimension_semantics = [#tpu.dimension_semantics<parallel>], iteration_bounds = array<i64: 2>, scalar_prefetch = 0 : i64, scratch_operands = 0 : i64, tpu.core_type = #tpu.core_type<tc>, window_params = [{transform_indices = @transform_0, window_bounds = array<i64: 128, 256>}, {pipeline_mode = #tpu.pipeline_mode<synchronous>, transform_indices = @transform_1, window_bounds = array<i64: 256, 16>}, {pipeline_mode = #tpu.pipeline_mode<synchronous>, transform_indices = @transform_2, window_bounds = array<i64: 8, 32>}, {pipeline_mode = #tpu.pipeline_mode<synchronous>, transform_indices = @transform_3, window_bounds = array<i64: 1, 32>}, {pipeline_mode = #tpu.pipeline_mode<synchronous>, transform_indices = @transform_4, window_bounds = array<i64: 32, 16>}, {transform_indices = @transform_5, window_bounds = array<i64: 128, 32>}]} {
    %c0 = arith.constant 0 : index
    %c0_0 = arith.constant 0 : index
    %0 = vector.load %arg1[%c0, %c0_0] : memref<128x256xbf16, #tpu.memory_space<vmem>>, vector<128x256xbf16>
    %c0_1 = arith.constant 0 : index
    %c0_2 = arith.constant 0 : index
    %1 = vector.load %arg2[%c0_1, %c0_2] : memref<256x16xbf16, #tpu.memory_space<vmem>>, vector<256x16xbf16>
    %cst = arith.constant dense<0.000000e+00> : vector<128x16xf32>
    %2 = tpu.matmul %0, %1, %cst {dimension_numbers = #tpu.dot_dimension_numbers<[1], [0], [0], [1], [0, 0, 1, 1], [], []>} : vector<128x256xbf16>, vector<256x16xbf16>, vector<128x16xf32> -> vector<128x16xf32>
    %c0_3 = arith.constant 0 : index
    %c0_4 = arith.constant 0 : index
    %3 = vector.load %arg3[%c0_3, %c0_4] : memref<8x32xf32, #tpu.memory_space<vmem>>, vector<8x32xf32>
    %c0_5 = arith.constant 0 : index
    %c0_6 = arith.constant 0 : index
    %4 = vector.load %arg4[%c0_5, %c0_6] : memref<1x32xf32, #tpu.memory_space<vmem>>, vector<1x32xf32>
    %c0_7 = arith.constant 0 : index
    %c0_8 = arith.constant 0 : index
    %5 = vector.load %arg5[%c0_7, %c0_8] : memref<32x16xf32, #tpu.memory_space<vmem>>, vector<32x16xf32>
    %6 = vector.extract_strided_slice %2 {offsets = [0, 0], sizes = [128, 8], strides = [1, 1]} : vector<128x16xf32> to vector<128x8xf32>
    %cst_9 = arith.constant dense<0.000000e+00> : vector<128x32xf32>
    %7 = tpu.matmul %6, %3, %cst_9 {dimension_numbers = #tpu.dot_dimension_numbers<[1], [0], [0], [1], [0, 0, 1, 1], [], []>} : vector<128x8xf32>, vector<8x32xf32>, vector<128x32xf32> -> vector<128x32xf32>
    %8 = vector.broadcast %4 : vector<1x32xf32> to vector<128x32xf32>
    %9 = arith.addf %7, %8 : vector<128x32xf32>
    %10 = vector.extract_strided_slice %2 {offsets = [0, 8], sizes = [128, 8], strides = [1, 1]} : vector<128x16xf32> to vector<128x8xf32>
    %cst_10 = arith.constant dense<0.000000e+00> : vector<128x32xf32>
    %11 = tpu.matmul %10, %3, %cst_10 {dimension_numbers = #tpu.dot_dimension_numbers<[1], [0], [0], [1], [0, 0, 1, 1], [], []>} : vector<128x8xf32>, vector<8x32xf32>, vector<128x32xf32> -> vector<128x32xf32>
    %12 = vector.broadcast %4 : vector<1x32xf32> to vector<128x32xf32>
    %13 = arith.addf %11, %12 : vector<128x32xf32>
    %cst_11 = arith.constant dense<0.000000e+00> : vector<128x16xf32>
    %14 = tpu.matmul %9, %5, %cst_11 {dimension_numbers = #tpu.dot_dimension_numbers<[1], [0], [0], [1], [0, 0, 1, 1], [], []>} : vector<128x32xf32>, vector<32x16xf32>, vector<128x16xf32> -> vector<128x16xf32>
    %cst_12 = arith.constant dense<0.000000e+00> : vector<128x16xf32>
    %15 = tpu.matmul %13, %5, %cst_12 {dimension_numbers = #tpu.dot_dimension_numbers<[1], [0], [0], [1], [0, 0, 1, 1], [], []>} : vector<128x32xf32>, vector<32x16xf32>, vector<128x16xf32> -> vector<128x16xf32>
    %16 = tpu.concatenate %14, %15 in 1 : vector<128x16xf32>, vector<128x16xf32> -> vector<128x32xf32>
    %c0_13 = arith.constant 0 : index
    %c0_14 = arith.constant 0 : index
    %17 = vector.load %arg6[%c0_13, %c0_14] : memref<128x32xf32, #tpu.memory_space<vmem>>, vector<128x32xf32>
    tpu.vector_store %arg6[%c0_13, %c0_14], %16 {strides = array<i32>} : memref<128x32xf32, #tpu.memory_space<vmem>>, vector<128x32xf32>,
    return
  }
  func.func @transform_0(%arg0: i32) -> (i32, i32) {
    %c0_i32 = arith.constant 0 : i32
    %c0_i32_0 = arith.constant 0 : i32
    return %arg0, %c0_i32 : i32, i32
  }
  func.func @transform_1(%arg0: i32) -> (i32, i32) {
    %c0_i32 = arith.constant 0 : i32
    %c0_i32_0 = arith.constant 0 : i32
    %c0_i32_1 = arith.constant 0 : i32
    return %c0_i32, %c0_i32_0 : i32, i32
  }
  func.func @transform_2(%arg0: i32) -> (i32, i32) {
    %c0_i32 = arith.constant 0 : i32
    %c0_i32_0 = arith.constant 0 : i32
    %c0_i32_1 = arith.constant 0 : i32
    return %c0_i32, %c0_i32_0 : i32, i32
  }
  func.func @transform_3(%arg0: i32) -> (i32, i32) {
    %c0_i32 = arith.constant 0 : i32
    %c0_i32_0 = arith.constant 0 : i32
    %c0_i32_1 = arith.constant 0 : i32
    return %c0_i32, %c0_i32_0 : i32, i32
  }
  func.func @transform_4(%arg0: i32) -> (i32, i32) {
    %c0_i32 = arith.constant 0 : i32
    %c0_i32_0 = arith.constant 0 : i32
    %c0_i32_1 = arith.constant 0 : i32
    return %c0_i32, %c0_i32_0 : i32, i32
  }
  func.func @transform_5(%arg0: i32) -> (i32, i32) {
    %c0_i32 = arith.constant 0 : i32
    %c0_i32_0 = arith.constant 0 : i32
    return %arg0, %c0_i32 : i32, i32
  }
}

</mosaic_0001>

<bundles_post_ra>
// kernel: tpu_custom_call.1
= control target key start
LH: loop header
LB: loop body
LE: loop exit
PB: predicated region body
PF: predicated region fallthrough
CT: control target
= control target key end

     0   :  { %10 = vsyncpa [#allocation3], 0  ;;  %s2525_s0 = inlined_call_operand.hbm [shape: bf16[256,256], index: 0, kind: input, shape index: {}]   ;;  %s2526_s1 = inlined_call_operand.vmem [shape: bf16[256,16], index: 1, kind: input, shape index: {}]   ;;  %s2527_s2 = inlined_call_operand.vmem [shape: f32[8,32], index: 2, kind: input, shape index: {}]   ;;  %s2528_s3 = inlined_call_operand.vmem [shape: f32[1,32], index: 3, kind: input, shape index: {}]   ;;  %s2529_s4 = inlined_call_operand.vmem [shape: f32[32,16], index: 4, kind: input, shape index: {}]   ;;  %s2530_s5 = inlined_call_operand.vmem [shape: f32[256,32], index: 5, kind: output, shape index: {}]  }
   0x1   :  { %12 = vsyncpa [#allocation3 + $0x1], 0  ;;  %s2107_s18 = smov 0   ;;  %s2109_s19 = smov 0  }
   0x2   :  { %s2111_s20 = smov 0   ;;  %s2113_s21 = smov 0  }
   0x3 LB: > { %s1536_s22 = sadd.s32 4294967295, %s2070_s21   ;;  %s2127_s23 = sadd.s32 1, %s2070_s21   ;;  %s2070_s21 = sphi %s2113_s21, %s2537_s21   ;;  %s2066_s20 = sphi %s2111_s20, %s2536_s20   ;;  %s2062_s19 = sphi %s2109_s19, %s2535_s19   ;;  %s2058_s18 = sphi %s2107_s18, %s2534_s18  }
   0x4   : > { %s22_s24 = ssub.s32 %s2070_s21, %s2127_s23  ;;  %s25_s25 = sadd.s32 1, %s2066_s20 }
   0x5   : > { %p23_p0 = scmp.eq.s32.totalorder %s22_s24, 0  ;;  %p32_p1 = scmp.ne.s32.totalorder %s2066_s20, %s2062_s19 }
   0x6   : > { %p33_p2 = scmp.eq.s32.totalorder %s2070_s21, 0  ;;  %p38_p3 = scmp.ne.s32.totalorder %s2062_s19, %s2058_s18 }
   0x7   : > { %s2137_s26 = scalar_select %p23_p0, %s2066_s20, %s25_s25  }
   0x8   : > { %p34_p4 = por %p33_p2, %p32_p1  ;;  %p39_p5 = scmp.eq.s32.totalorder %s1536_s22, 0 }
   0x9   : > { %p1929_p6 = scmp.lt.s32.totalorder %s2070_s21, 2  ;;  %s184_s28 = sand.u32 1, %s2066_s20  }
   0xa   : > { %p2142_p7 = por %p39_p5, %p38_p3  ;;  %s1540_s29 = sshll.u32 %s184_s28, 7 }
   0xb   : > { %s1648_s30 = sshll.u32 %s2070_s21, 11  ;;  %s188_s9 = scalar_lea.vmem [#allocation2], %s1540_s29 }
   0xc   : > { %s2151_s8 = scalar_lea.hbm %s2525_s0, %s1648_s30  ;;  %s196_s10 = sshll.u32 %s188_s9, 4  ;;  %s2153_s10 = int_to_ptr.vmem [resolvable:$true] %s196_s10 }
   0xd   : > { %p2155_p8 = pnand %p1929_p6, %p34_p4  ;;  %s2160_s12 = scalar_lea.sflag [#allocation3], %s184_s28 }
   0xe   : > { %s2006_s13 = scalar_lea.hbm %s2151_s8, 2048  ;;  %s2011_s16 = scalar_lea.hbm %s2525_s0, 4096 }
   0xf   : > { %p2007_p10 = scmp.ne.s32.totalorder %s2151_s8, %s2006_s13  ;;  %p2008_p11 = pneg %p2155_p8 }
  0x10   : > { %p2012_p0 = scmp.lt.u32.totalorder %s2151_s8, %s2525_s0  ;;  %p2013_p1 = scmp.lt.u32.totalorder %s2011_s16, %s2006_s13 }
  0x11   : > { %p2009_p12 = pnand %p2008_p11, %p2007_p10  ;;  %p2015_p3 = scmp.lt.u32.totalorder %s2006_s13, %s2151_s8 }
  0x12   : > { %p2014_p2 = por %p2013_p1, %p2012_p0 }
  0x13   : > { %p2010_p13 = pneg %p2009_p12 }
  0x14   : > { %p2016_p4 = por %p2015_p3, %p2014_p2 }
  0x16   : > { %p2017_p5 = pnand %p2016_p4, %p2010_p13 }
  0x18   : > { %2020 = shalt.err (!%p2017_p5)
}
  0x19   : > { %s2021_s24 = scalar_lea.vmem %s2153_s10, 2048  ;;  %s2072_s25 = smov [#allocation2]  }
  0x1a   : > { %p2022_p6 = scmp.ne.s32.totalorder %s2153_s10, %s2021_s24  ;;  %s2026_s28 = sshll.u32 %s2072_s25, 4  ;;  %s2027_s28 = int_to_ptr.vmem [resolvable:$false] %s2026_s28 }
  0x1b   : > { %s2028_s29 = scalar_lea.vmem %s2027_s28, 4096  ;;  %p2029_p9 = scmp.lt.s32.totalorder %s2153_s10, %s2027_s28 }
  0x1c   : > { %p2024_p10 = pnand %p2022_p6, %p2008_p11  ;;  %p2030_p0 = scmp.lt.s32.totalorder %s2028_s29, %s2021_s24 }
  0x1e   : > { %p2025_p12 = pneg %p2024_p10  ;;  %p2031_p1 = por %p2030_p0, %p2029_p9 }
  0x20   : > { %p2032_p2 = pnand %p2031_p1, %p2025_p12 }
  0x22   : > { %2035 = shalt.err (!%p2032_p2)
}
  0x23   : > { %s2073_s30 = smov 128   ;;  %s2074_s6 = smov 8  }
  0x24   : > { %1928 = dma.hbm_to_vmem [thread:$0]  (!%p2155_p8), %s2151_s8, 2048, %s2153_s10, %s2160_s12, %s2073_s30, %s2073_s30, %s2074_s6  }
  0x25   : > { %p204_p11 = scmp.lt.s32.totalorder %s2070_s21, 3  ;;  %p2533_p13 = scmp.ge.s32.totalorder %s2070_s21, 1 }
  0x27   : > { %p205_p3 = pnand %p2533_p13, %p204_p11 }
  0x28   : > { %s210_s7 = sand.u32 (!%p205_p3), 1, %s2062_s19  }
  0x29   : > { %208 = sbr.rel (%p205_p3) target bundleno = 1016 (0x3f8), region = 40  ;;  %s1545_s9 = sshll.u32 (!%p205_p3), %s210_s7, 7 }
  0x2a   : > { %s211_s13 = scalar_lea.sflag (!%p205_p3), [#allocation3], %s210_s7  ;;  %s2192_s14 = scalar_lea.vmem (!%p205_p3), [#allocation2], %s1545_s9 }
  0x30   : > { %2053 = dma.done.wait (%p2142_p7), %s211_s13, 2048  }
  0x31   : > { %2055 = vsyncadd (%p2142_p7), %s211_s13, 4294965248  ;;  %v1966_v0 = vld [vmem:[%s2526_s1 + $0x40] sm:$0xff]   ;;  %v1968_v2 = vld [vmem:[%s2526_s1 + $0x48] sm:$0xff]   ;;  %vm582_vm0 = vcmask 64512   ;;  %s2075_s9 = smov 120   ;;  %vm985_vm1 = vcmask 261120  }
  0x32   : > { %v1967_v1 = vld [vmem:[%s2526_s1] sm:$0xff]   ;;  %1649 = vmatprep.subr.bf16.mxu0 %v1966_v0  ;;  %v1969_v3 = vld [vmem:[%s2526_s1 + $0x8] sm:$0xff]   ;;  %v1970_v4 = vld [vmem:[%s2526_s1 + $0x50] sm:$0xff]   ;;  %s2076_s27 = smov 16   ;;  %s1546_s24 = sshll.u32 %s1536_s22, 4  ;;  %vm1436_vm2 = vcmask 130048  }
  0x33   : > { %1650 = vmatpush3.bf16.msra.mxu0 %v1967_v1  ;;  %v1971_v5 = vld [vmem:[%s2526_s1 + $0x10] sm:$0xff]   ;;  %v1972_v6 = vld [vmem:[%s2526_s1 + $0x58] sm:$0xff]   ;;  %v1974_v8 = vld [vmem:[%s2526_s1 + $0x60] sm:$0xff]   ;;  %p243_p7 = scmp.lt.s32.totalorder %s1546_s24, 31 }
  0x34   : > { %1651 = vmatprep.subr.bf16.mxu0 %v1968_v2  ;;  %v1973_v7 = vld [vmem:[%s2526_s1 + $0x18] sm:$0xff]   ;;  %v1975_v9 = vld [vmem:[%s2526_s1 + $0x20] sm:$0xff]   ;;  %v1976_v10 = vld [vmem:[%s2526_s1 + $0x68] sm:$0xff]  }
  0x35   : > { %v1984_v11 = vld [vmem:[%s2192_s14 + $0x4] ss:$8 sps:$4 sm:$0xff]   ;;  %v1978_v13 = vld [vmem:[%s2526_s1 + $0x70] sm:$0xff]   ;;  %v1980_v15 = vld [vmem:[%s2526_s1 + $0x78] sm:$0xff]   ;;  %s2539_s24 = smov (!%p243_p7, %s1546_s24), 31 }
  0x36   : > { %v1977_v12 = vld [vmem:[%s2526_s1 + $0x28] sm:$0xff]   ;;  %505 = vmatprep.mubr.bf16.mxu0 %v1984_v11  ;;  %v1979_v14 = vld [vmem:[%s2526_s1 + $0x30] sm:$0xff]   ;;  %v1981_v16 = vld [vmem:[%s2526_s1 + $0x38] sm:$0xff]   ;;  %s1547_s25 = sshll.u32 %s2539_s24, 3 }
  0x37   : > { %1652 = vmatpush3.bf16.msra.mxu0 %v1969_v3  ;;  %v1982_v17 = vld [vmem:[%s2192_s14] ss:$8 sps:$4 sm:$0xff]   ;;  %v1985_v18 = vld [vmem:[%s2192_s14 + $0x14] ss:$8 sps:$4 sm:$0xff]   ;;  %v1987_v19 = vld [vmem:[%s2192_s14 + $0x10] ss:$8 sps:$4 sm:$0xff]   ;;  %s2449_s30 = scalar_lea.vmem %s2530_s5, %s1547_s25 }
  0x38   : > { %1653 = vmatprep.subr.bf16.mxu0 %v1970_v4  ;;  %v1988_v20 = vld [vmem:[%s2192_s14 + $0x24] ss:$8 sps:$4 sm:$0xff]   ;;  %v1990_v21 = vld [vmem:[%s2192_s14 + $0x20] ss:$8 sps:$4 sm:$0xff]   ;;  %v1991_v22 = vld [vmem:[%s2192_s14 + $0x34] ss:$8 sps:$4 sm:$0xff]  }
  0x39   : > { %v1993_v23 = vld [vmem:[%s2192_s14 + $0x30] ss:$8 sps:$4 sm:$0xff]   ;;  %v1994_v24 = vld [vmem:[%s2192_s14 + $0x44] ss:$8 sps:$4 sm:$0xff]   ;;  %v1996_v25 = vld [vmem:[%s2192_s14 + $0x40] ss:$8 sps:$4 sm:$0xff]  }
  0x3a   : > { %v1997_v26 = vld [vmem:[%s2192_s14 + $0x54] ss:$8 sps:$4 sm:$0xff]   ;;  %v1999_v27 = vld [vmem:[%s2192_s14 + $0x50] ss:$8 sps:$4 sm:$0xff]   ;;  %v2000_v28 = vld [vmem:[%s2192_s14 + $0x64] ss:$8 sps:$4 sm:$0xff]  }
  0x3b   : > { %1654 = vmatpush3.bf16.msra.mxu0 %v1971_v5  ;;  %v2002_v29 = vld [vmem:[%s2192_s14 + $0x60] ss:$8 sps:$4 sm:$0xff]   ;;  %v2003_v30 = vld [vmem:[%s2192_s14 + $0x74] ss:$8 sps:$4 sm:$0xff]   ;;  %v2005_v31 = vld [vmem:[%s2192_s14 + $0x70] ss:$8 sps:$4 sm:$0xff]  }
  0x3c   : > { %1655 = vmatprep.subr.bf16.mxu0 %v1972_v6  ;;  %v570_v32 = vld [vmem:[%s2527_s2] sm:$0xff] }
  0x3d   : > { %1787 = vmatprep.subr.mxu1 %v570_v32 }
  0x3e   : > { %1788 = vmatpush3.msra.mxu1 %v570_v32 }
  0x3f   : > { %1656 = vmatpush3.bf16.msra.mxu0 %v1973_v7  ;;  %1813 = vmatprep.subr.mxu1 %v570_v32  ;;  %v572_v7 = vld [vmem:[%s2529_s4] sm:$0xff] }
  0x40   : > { %1657 = vmatprep.subr.bf16.mxu0 %v1974_v8  ;;  %v573_v8 = vld [vmem:[%s2529_s4 + $0x8] sm:$0xff] }
  0x41   : > { %v2295_v11 = vpack.c.bf16 %v573_v8, %v572_v7 }
  0x43   : > { %1658 = vmatpush3.bf16.msra.mxu0 %v1975_v9 }
  0x44   : > { %1659 = vmatprep.subr.bf16.mxu0 %v1976_v10 }
  0x47   : > { %1660 = vmatpush3.bf16.msra.mxu0 %v1977_v12 }
  0x48   : > { %1661 = vmatprep.subr.bf16.mxu0 %v1978_v13 }
  0x4b   : > { %1662 = vmatpush3.bf16.msra.mxu0 %v1979_v14 }
  0x4c   : > { %1663 = vmatprep.subr.bf16.mxu0 %v1980_v15 }
  0x4f   : > { %1664 = vmatpush3.bf16.msra.mxu0 %v1981_v16 }
  0x50   : > { %1912 = vmatprep.subr.bf16.mxu0 %v2295_v11 }
  0x52   : > { %506 = vmatmul.mubr.bf16.vlgmr.msra.gmra.mrb[0].mxu0 %v1982_v17 }
  0x53   : > { %513 = vmatprep.mubr.bf16.mxu0 %v1985_v18  ;;  %1914 = vmatpush3.bf16.msra.mxu0 %v2295_v11 }
  0x5a   : > { %514 = vmatmul.mubr.bf16.gmra.mrb[4].mxu0 %v1987_v19 }
  0x5b   : > { %521 = vmatprep.mubr.bf16.mxu0 %v1988_v20  ;;  %v574_v20 = vld [vmem:[%s2529_s4 + $0x10] sm:$0xff] }
  0x62   : > { %522 = vmatmul.mubr.bf16.gmra.mrb[8].mxu0 %v1990_v21  ;;  %v575_v21 = vld [vmem:[%s2529_s4 + $0x18] sm:$0xff] }
  0x63   : > { %529 = vmatprep.mubr.bf16.mxu0 %v1991_v22  ;;  %v1907_v22 = vpack.c.bf16 %v575_v21, %v574_v20 }
  0x65   : > { %1916 = vmatprep.subr.bf16.mxu0 %v1907_v22 }
  0x66   : > { %1918 = vmatpush3.bf16.msra.mxu0 %v1907_v22 }
  0x6a   : > { %530 = vmatmul.mubr.bf16.gmra.mrb[12].mxu0 %v1993_v23 }
  0x6b   : > { %537 = vmatprep.mubr.bf16.mxu0 %v1994_v24 }
  0x72   : > { %538 = vmatmul.mubr.bf16.gmra.mrb[16].mxu0 %v1996_v25 }
  0x73   : > { %545 = vmatprep.mubr.bf16.mxu0 %v1997_v26 }
  0x7a   : > { %546 = vmatmul.mubr.bf16.gmra.mrb[20].mxu0 %v1999_v27 }
  0x7b   : > { %553 = vmatprep.mubr.bf16.mxu0 %v2000_v28 }
  0x82   : > { %554 = vmatmul.mubr.bf16.gmra.mrb[24].mxu0 %v2002_v29 }
  0x83   : > { %561 = vmatprep.mubr.bf16.mxu0 %v2003_v30 }
  0x8a   : > { %562 = vmatmul.mubr.bf16.gmra.mrb[28].mxu0 %v2005_v31 }
 0x125   : > { %v1665_v33 = vpop.f32.mrb[0].mxu0 }
 0x126   : > { %v1666_v34 = vpop.f32.mrb[1].mxu0 }
 0x127   : > { %v1667_v35 = vadd.f32 %v1666_v34, %v1665_v33  ;;  %v1668_v36 = vpop.f32.mrb[2].mxu0 }
 0x128   : > { %v1669_v37 = vpop.f32.mrb[3].mxu0 }
 0x129   : > { %v1670_v38 = vadd.f32 %v1669_v37, %v1668_v36  ;;  %776 = vrot.lane.b32.xlu0 %v1667_v35, %s2075_s9  ;;  %1789 = vmatprep.mubr.msk.f32.mxu1 %vm582_vm0, %v1667_v35 }
 0x12b   : > { %1790 = vmatmul.mubr.msk.f32.vlgmr.msra.gmra.mrb[0].mxu1 %vm582_vm0, %v1670_v38 }
 0x12c   : > { %1814 = vmatpush3.msra.mxu1 %v570_v32 }
 0x12d   : > { %v1671_v39 = vpop.f32.mrb[4].mxu0  ;;  %778 = vrot.lane.b32.xlu0 %v1670_v38, %s2075_s9  ;;  %1904 = vmatprep.subr.bf16.mxu1 %v2295_v11 }
 0x12e   : > { %v1672_v40 = vpop.f32.mrb[5].mxu0 }
 0x12f   : > { %v1673_v41 = vadd.f32 %v1672_v40, %v1671_v39  ;;  %v1674_v42 = vpop.f32.mrb[6].mxu0  ;;  %v2335_v39 = vld [vmem:[%s2528_s3] ss:$0 sm:$0xff] }
 0x130   : > { %v1675_v43 = vpop.f32.mrb[7].mxu0 }
 0x131   : > { %v1676_v44 = vadd.f32 %v1675_v43, %v1674_v42  ;;  %780 = vrot.lane.b32.xlu1 %v1673_v41, %s2075_s9  ;;  %1792 = vmatprep.mubr.msk.f32.mxu1 %vm582_vm0, %v1673_v41 }
 0x133   : > { %1793 = vmatmul.mubr.msk.f32.gmra.mrb[2].mxu1 %vm582_vm0, %v1676_v44 }
 0x135   : > { %v1677_v45 = vpop.f32.mrb[8].mxu0  ;;  %782 = vrot.lane.b32.xlu1 %v1676_v44, %s2075_s9 }
 0x136   : > { %v1678_v46 = vpop.f32.mrb[9].mxu0 }
 0x137   : > { %v1679_v47 = vadd.f32 %v1678_v46, %v1677_v45  ;;  %v1680_v48 = vpop.f32.mrb[10].mxu0 }
 0x138   : > { %v1681_v49 = vpop.f32.mrb[11].mxu0 }
 0x139   : > { %v1682_v50 = vadd.f32 %v1681_v49, %v1680_v48  ;;  %784 = vrot.lane.b32.xlu0 %v1679_v47, %s2075_s9  ;;  %1795 = vmatprep.mubr.msk.f32.mxu1 %vm582_vm0, %v1679_v47 }
 0x13b   : > { %786 = vrot.lane.b32.xlu1 %v1682_v50, %s2075_s9  ;;  %1796 = vmatmul.mubr.msk.f32.gmra.mrb[4].mxu1 %vm582_vm0, %v1682_v50 }
 0x13d   : > { %v1683_v51 = vpop.f32.mrb[12].mxu0 }
 0x13e   : > { %v1684_v52 = vpop.f32.mrb[13].mxu0 }
 0x13f   : > { %v1685_v53 = vadd.f32 %v1684_v52, %v1683_v51  ;;  %v1686_v54 = vpop.f32.mrb[14].mxu0 }
 0x140   : > { %v1687_v55 = vpop.f32.mrb[15].mxu0 }
 0x141   : > { %v1688_v56 = vadd.f32 %v1687_v55, %v1686_v54  ;;  %788 = vrot.lane.b32.xlu0 %v1685_v53, %s2075_s9  ;;  %1798 = vmatprep.mubr.msk.f32.mxu1 %vm582_vm0, %v1685_v53 }
 0x143   : > { %790 = vrot.lane.b32.xlu1 %v1688_v56, %s2075_s9  ;;  %1799 = vmatmul.mubr.msk.f32.gmra.mrb[6].mxu1 %vm582_vm0, %v1688_v56 }
 0x145   : > { %v1689_v57 = vpop.f32.mrb[16].mxu0 }
 0x146   : > { %v1690_v58 = vpop.f32.mrb[17].mxu0 }
 0x147   : > { %v1691_v59 = vadd.f32 %v1690_v58, %v1689_v57  ;;  %v1692_v60 = vpop.f32.mrb[18].mxu0 }
 0x148   : > { %v1693_v61 = vpop.f32.mrb[19].mxu0 }
 0x149   : > { %v1694_v62 = vadd.f32 %v1693_v61, %v1692_v60  ;;  %792 = vrot.lane.b32.xlu0 %v1691_v59, %s2075_s9  ;;  %1801 = vmatprep.mubr.msk.f32.mxu1 %vm582_vm0, %v1691_v59 }
 0x14b   : > { %794 = vrot.lane.b32.xlu1 %v1694_v62, %s2075_s9  ;;  %1802 = vmatmul.mubr.msk.f32.gmra.mrb[8].mxu1 %vm582_vm0, %v1694_v62 }
 0x14d   : > { %v1695_v63 = vpop.f32.mrb[20].mxu0 }
 0x14e   : > { %v1696_v0 = vpop.f32.mrb[21].mxu0 }
 0x14f   : > { %v1697_v1 = vadd.f32 %v1696_v0, %v1695_v63  ;;  %v1698_v2 = vpop.f32.mrb[22].mxu0 }
 0x150   : > { %v1699_v3 = vpop.f32.mrb[23].mxu0 }
 0x151   : > { %v1700_v4 = vadd.f32 %v1699_v3, %v1698_v2  ;;  %796 = vrot.lane.b32.xlu0 %v1697_v1, %s2075_s9  ;;  %1804 = vmatprep.mubr.msk.f32.mxu1 %vm582_vm0, %v1697_v1 }
 0x153   : > { %798 = vrot.lane.b32.xlu1 %v1700_v4, %s2075_s9  ;;  %1805 = vmatmul.mubr.msk.f32.gmra.mrb[10].mxu1 %vm582_vm0, %v1700_v4 }
 0x155   : > { %v1701_v5 = vpop.f32.mrb[24].mxu0 }
 0x156   : > { %v1702_v6 = vpop.f32.mrb[25].mxu0 }
 0x157   : > { %v1703_v9 = vadd.f32 %v1702_v6, %v1701_v5  ;;  %v1704_v10 = vpop.f32.mrb[26].mxu0 }
 0x158   : > { %v1705_v12 = vpop.f32.mrb[27].mxu0 }
 0x159   : > { %v1706_v13 = vadd.f32 %v1705_v12, %v1704_v10  ;;  %800 = vrot.lane.b32.xlu0 %v1703_v9, %s2075_s9  ;;  %1807 = vmatprep.mubr.msk.f32.mxu1 %vm582_vm0, %v1703_v9 }
 0x15b   : > { %802 = vrot.lane.b32.xlu1 %v1706_v13, %s2075_s9  ;;  %1808 = vmatmul.mubr.msk.f32.gmra.mrb[12].mxu1 %vm582_vm0, %v1706_v13 }
 0x15d   : > { %v1707_v14 = vpop.f32.mrb[28].mxu0 }
 0x15e   : > { %v1708_v15 = vpop.f32.mrb[29].mxu0 }
 0x15f   : > { %v1709_v16 = vadd.f32 %v1708_v15, %v1707_v14  ;;  %v1710_v17 = vpop.f32.mrb[30].mxu0 }
 0x160   : > { %v1711_v18 = vpop.f32.mrb[31].mxu0 }
 0x161   : > { %v1712_v19 = vadd.f32 %v1711_v18, %v1710_v17  ;;  %804 = vrot.lane.b32.xlu0 %v1709_v16, %s2075_s9  ;;  %1810 = vmatprep.mubr.msk.f32.mxu1 %vm582_vm0, %v1709_v16 }
 0x163   : > { %806 = vrot.lane.b32.xlu1 %v1712_v19, %s2075_s9  ;;  %1811 = vmatmul.mubr.msk.f32.gmra.mrb[14].mxu1 %vm582_vm0, %v1712_v19 }
 0x19b   : > { %v777_v23 = vpop.permute.xlu0 %776 }
 0x19c   : > { %1815 = vmatprep.mubr.msk.f32.mxu1 %vm582_vm0, %v777_v23 }
 0x19f   : > { %v779_v24 = vpop.permute.xlu0 %778 }
 0x1a0   : > { %1816 = vmatmul.mubr.msk.f32.vlgmr.msra.gmra.mrb[16].mxu1 %vm582_vm0, %v779_v24 }
 0x1a1   : > { %1906 = vmatpush3.bf16.msra.mxu1 %v2295_v11 }
 0x1a2   : > { %1908 = vmatprep.subr.bf16.mxu1 %v1907_v22 }
 0x1a3   : > { %v781_v25 = vpop.permute.xlu1 %780 }
 0x1a4   : > { %1818 = vmatprep.mubr.msk.f32.mxu1 %vm582_vm0, %v781_v25 }
 0x1a5   : > { %1910 = vmatpush3.bf16.msra.mxu1 %v1907_v22 }
 0x1a6   : > { %1919 = vmatprep.subr.bf16.mxu1 %v2295_v11 }
 0x1a7   : > { %v783_v26 = vpop.permute.xlu1 %782 }
 0x1a8   : > { %1819 = vmatmul.mubr.msk.f32.gmra.mrb[18].mxu1 %vm582_vm0, %v783_v26 }
 0x1ab   : > { %v785_v27 = vpop.permute.xlu0 %784 }
 0x1ac   : > { %1821 = vmatprep.mubr.msk.f32.mxu1 %vm582_vm0, %v785_v27 }
 0x1ad   : > { %v787_v28 = vpop.permute.xlu1 %786 }
 0x1ae   : > { %1822 = vmatmul.mubr.msk.f32.gmra.mrb[20].mxu1 %vm582_vm0, %v787_v28 }
 0x1b3   : > { %v789_v29 = vpop.permute.xlu0 %788 }
 0x1b4   : > { %1824 = vmatprep.mubr.msk.f32.mxu1 %vm582_vm0, %v789_v29 }
 0x1b5   : > { %v791_v30 = vpop.permute.xlu1 %790 }
 0x1b6   : > { %1825 = vmatmul.mubr.msk.f32.gmra.mrb[22].mxu1 %vm582_vm0, %v791_v30 }
 0x1bb   : > { %v793_v31 = vpop.permute.xlu0 %792 }
 0x1bc   : > { %1827 = vmatprep.mubr.msk.f32.mxu1 %vm582_vm0, %v793_v31 }
 0x1bd   : > { %v795_v32 = vpop.permute.xlu1 %794 }
 0x1be   : > { %1828 = vmatmul.mubr.msk.f32.gmra.mrb[24].mxu1 %vm582_vm0, %v795_v32 }
 0x1c3   : > { %v797_v33 = vpop.permute.xlu0 %796 }
 0x1c4   : > { %1830 = vmatprep.mubr.msk.f32.mxu1 %vm582_vm0, %v797_v33 }
 0x1c5   : > { %v799_v34 = vpop.permute.xlu1 %798 }
 0x1c6   : > { %1831 = vmatmul.mubr.msk.f32.gmra.mrb[26].mxu1 %vm582_vm0, %v799_v34 }
 0x1cb   : > { %v801_v35 = vpop.permute.xlu0 %800 }
 0x1cc   : > { %1833 = vmatprep.mubr.msk.f32.mxu1 %vm582_vm0, %v801_v35 }
 0x1cd   : > { %v803_v36 = vpop.permute.xlu1 %802 }
 0x1ce   : > { %1834 = vmatmul.mubr.msk.f32.gmra.mrb[28].mxu1 %vm582_vm0, %v803_v36 }
 0x1d3   : > { %v805_v37 = vpop.permute.xlu0 %804 }
 0x1d4   : > { %1836 = vmatprep.mubr.msk.f32.mxu1 %vm582_vm0, %v805_v37 }
 0x1d5   : > { %v807_v38 = vpop.permute.xlu1 %806 }
 0x1d6   : > { %1837 = vmatmul.mubr.msk.f32.gmra.mrb[30].mxu1 %vm582_vm0, %v807_v38 }
 0x1fe   : > { %v1791_v40 = vpop.f32.mrb[0].mxu1 }
 0x1ff   : > { %v697_v41 = vpop.f32.mrb[1].mxu1  ;;  %v703_v43 = vadd.f32 %v1791_v40, %v2335_v39 }
 0x200   : > { %v698_v42 = vadd.f32 %v2335_v39, %v697_v41 }
 0x202   : > { %1847 = vmatprep.mubr.msk.f32.mxu1 %vm985_vm1, %v698_v42 }
 0x203   : > { %1848 = vmatmul.mubr.msk.f32.vlgmr.msra.gmra.mrb[32].mxu1 %vm985_vm1, %v703_v43 }
 0x204   : > { %1921 = vmatpush3.bf16.msra.mxu1 %v2295_v11 }
 0x205   : > { %1920 = vmatprep.subr.bf16.mxu1 %v1907_v22 }
 0x206   : > { %v1794_v44 = vpop.f32.mrb[2].mxu1 }
 0x207   : > { %v707_v45 = vpop.f32.mrb[3].mxu1  ;;  %v713_v47 = vadd.f32 %v1794_v44, %v2335_v39 }
 0x208   : > { %v708_v46 = vadd.f32 %v2335_v39, %v707_v45  ;;  %1922 = vmatpush3.bf16.msra.mxu1 %v1907_v22 }
 0x20a   : > { %1850 = vmatprep.mubr.msk.f32.mxu1 %vm985_vm1, %v708_v46 }
 0x20b   : > { %1851 = vmatmul.mubr.msk.f32.gmra.mrb[34].mxu1 %vm985_vm1, %v713_v47 }
 0x20e   : > { %v1797_v48 = vpop.f32.mrb[4].mxu1 }
 0x20f   : > { %v717_v49 = vpop.f32.mrb[5].mxu1  ;;  %v723_v51 = vadd.f32 %v1797_v48, %v2335_v39 }
 0x210   : > { %v718_v50 = vadd.f32 %v2335_v39, %v717_v49 }
 0x212   : > { %1853 = vmatprep.mubr.msk.f32.mxu1 %vm985_vm1, %v718_v50 }
 0x213   : > { %1854 = vmatmul.mubr.msk.f32.gmra.mrb[36].mxu1 %vm985_vm1, %v723_v51 }
 0x216   : > { %v1800_v52 = vpop.f32.mrb[6].mxu1 }
 0x217   : > { %v727_v53 = vpop.f32.mrb[7].mxu1  ;;  %v733_v55 = vadd.f32 %v1800_v52, %v2335_v39 }
 0x218   : > { %v728_v54 = vadd.f32 %v2335_v39, %v727_v53 }
 0x21a   : > { %1856 = vmatprep.mubr.msk.f32.mxu1 %vm985_vm1, %v728_v54 }
 0x21b   : > { %1857 = vmatmul.mubr.msk.f32.gmra.mrb[38].mxu1 %vm985_vm1, %v733_v55 }
 0x21e   : > { %v1803_v56 = vpop.f32.mrb[8].mxu1 }
 0x21f   : > { %v737_v57 = vpop.f32.mrb[9].mxu1  ;;  %v743_v59 = vadd.f32 %v1803_v56, %v2335_v39 }
 0x220   : > { %v738_v58 = vadd.f32 %v2335_v39, %v737_v57 }
 0x222   : > { %1859 = vmatprep.mubr.msk.f32.mxu1 %vm985_vm1, %v738_v58 }
 0x223   : > { %1860 = vmatmul.mubr.msk.f32.gmra.mrb[40].mxu1 %vm985_vm1, %v743_v59 }
 0x226   : > { %v1806_v60 = vpop.f32.mrb[10].mxu1 }
 0x227   : > { %v747_v61 = vpop.f32.mrb[11].mxu1  ;;  %v753_v63 = vadd.f32 %v1806_v60, %v2335_v39 }
 0x228   : > { %v748_v62 = vadd.f32 %v2335_v39, %v747_v61 }
 0x22a   : > { %1862 = vmatprep.mubr.msk.f32.mxu1 %vm985_vm1, %v748_v62 }
 0x22b   : > { %1863 = vmatmul.mubr.msk.f32.gmra.mrb[42].mxu1 %vm985_vm1, %v753_v63 }
 0x22e   : > { %v1809_v0 = vpop.f32.mrb[12].mxu1 }
 0x22f   : > { %v757_v1 = vpop.f32.mrb[13].mxu1  ;;  %v763_v3 = vadd.f32 %v1809_v0, %v2335_v39 }
 0x230   : > { %v758_v2 = vadd.f32 %v2335_v39, %v757_v1 }
 0x232   : > { %1865 = vmatprep.mubr.msk.f32.mxu1 %vm985_vm1, %v758_v2 }
 0x233   : > { %1866 = vmatmul.mubr.msk.f32.gmra.mrb[44].mxu1 %vm985_vm1, %v763_v3 }
 0x236   : > { %v1812_v4 = vpop.f32.mrb[14].mxu1 }
 0x237   : > { %v767_v5 = vpop.f32.mrb[15].mxu1  ;;  %v773_v7 = vadd.f32 %v1812_v4, %v2335_v39 }
 0x238   : > { %v768_v6 = vadd.f32 %v2335_v39, %v767_v5 }
 0x23a   : > { %1868 = vmatprep.mubr.msk.f32.mxu1 %vm985_vm1, %v768_v6 }
 0x23b   : > { %1869 = vmatmul.mubr.msk.f32.gmra.mrb[46].mxu1 %vm985_vm1, %v773_v7 }
 0x273   : > { %v1817_v8 = vpop.f32.mrb[16].mxu1 }
 0x274   : > { %v906_v9 = vpop.f32.mrb[17].mxu1  ;;  %v912_v11 = vadd.f32 %v1817_v8, %v2335_v39 }
 0x275   : > { %v907_v10 = vadd.f32 %v2335_v39, %v906_v9 }
 0x277   : > { %1879 = vmatprep.mubr.msk.f32.mxu0 %vm985_vm1, %v907_v10 }
 0x278   : > { %1880 = vmatmul.mubr.msk.f32.vlgmr.msra.gmra.mrb[32].mxu0 %vm985_vm1, %v912_v11 }
 0x27b   : > { %v1820_v12 = vpop.f32.mrb[18].mxu1 }
 0x27c   : > { %v916_v13 = vpop.f32.mrb[19].mxu1  ;;  %v922_v15 = vadd.f32 %v1820_v12, %v2335_v39 }
 0x27d   : > { %v917_v14 = vadd.f32 %v2335_v39, %v916_v13 }
 0x27f   : > { %1882 = vmatprep.mubr.msk.f32.mxu0 %vm985_vm1, %v917_v14 }
 0x280   : > { %1883 = vmatmul.mubr.msk.f32.gmra.mrb[34].mxu0 %vm985_vm1, %v922_v15 }
 0x281   : > { %v1823_v16 = vpop.f32.mrb[20].mxu1 }
 0x282   : > { %v926_v17 = vpop.f32.mrb[21].mxu1  ;;  %v932_v19 = vadd.f32 %v1823_v16, %v2335_v39 }
 0x283   : > { %v927_v18 = vadd.f32 %v2335_v39, %v926_v17 }
 0x285   : > { %1885 = vmatprep.mubr.msk.f32.mxu0 %vm985_vm1, %v927_v18 }
 0x286   : > { %1886 = vmatmul.mubr.msk.f32.gmra.mrb[36].mxu0 %vm985_vm1, %v932_v19 }
 0x289   : > { %v1826_v20 = vpop.f32.mrb[22].mxu1 }
 0x28a   : > { %v936_v21 = vpop.f32.mrb[23].mxu1  ;;  %v942_v23 = vadd.f32 %v1826_v20, %v2335_v39 }
 0x28b   : > { %v937_v22 = vadd.f32 %v2335_v39, %v936_v21 }
 0x28d   : > { %1888 = vmatprep.mubr.msk.f32.mxu0 %vm985_vm1, %v937_v22 }
 0x28e   : > { %1889 = vmatmul.mubr.msk.f32.gmra.mrb[38].mxu0 %vm985_vm1, %v942_v23 }
 0x291   : > { %v1829_v24 = vpop.f32.mrb[24].mxu1 }
 0x292   : > { %v946_v25 = vpop.f32.mrb[25].mxu1  ;;  %v952_v27 = vadd.f32 %v1829_v24, %v2335_v39 }
 0x293   : > { %v947_v26 = vadd.f32 %v2335_v39, %v946_v25 }
 0x295   : > { %1891 = vmatprep.mubr.msk.f32.mxu0 %vm985_vm1, %v947_v26 }
 0x296   : > { %1892 = vmatmul.mubr.msk.f32.gmra.mrb[40].mxu0 %vm985_vm1, %v952_v27 }
 0x299   : > { %v1832_v28 = vpop.f32.mrb[26].mxu1 }
 0x29a   : > { %v956_v29 = vpop.f32.mrb[27].mxu1  ;;  %v962_v31 = vadd.f32 %v1832_v28, %v2335_v39 }
 0x29b   : > { %v957_v30 = vadd.f32 %v2335_v39, %v956_v29 }
 0x29d   : > { %1894 = vmatprep.mubr.msk.f32.mxu1 %vm985_vm1, %v957_v30 }
 0x29e   : > { %1895 = vmatmul.mubr.msk.f32.vlgmr.msra.gmra.mrb[48].mxu1 %vm985_vm1, %v962_v31 }
 0x2a1   : > { %v1835_v32 = vpop.f32.mrb[28].mxu1 }
 0x2a2   : > { %v966_v33 = vpop.f32.mrb[29].mxu1  ;;  %v972_v35 = vadd.f32 %v1835_v32, %v2335_v39 }
 0x2a3   : > { %v967_v34 = vadd.f32 %v2335_v39, %v966_v33 }
 0x2a5   : > { %1897 = vmatprep.mubr.msk.f32.mxu1 %vm985_vm1, %v967_v34 }
 0x2a6   : > { %1898 = vmatmul.mubr.msk.f32.gmra.mrb[50].mxu1 %vm985_vm1, %v972_v35 }
 0x2a9   : > { %v1838_v36 = vpop.f32.mrb[30].mxu1 }
 0x2aa   : > { %v976_v37 = vpop.f32.mrb[31].mxu1  ;;  %v982_v40 = vadd.f32 %v1838_v36, %v2335_v39 }
 0x2ab   : > { %v977_v38 = vadd.f32 %v2335_v39, %v976_v37 }
 0x2ad   : > { %1900 = vmatprep.mubr.msk.f32.mxu1 %vm985_vm1, %v977_v38 }
 0x2ae   : > { %1901 = vmatmul.mubr.msk.f32.gmra.mrb[52].mxu1 %vm985_vm1, %v982_v40 }
 0x2d6   : > { %v1849_v41 = vpop.f32.mrb[32].mxu1 }
 0x2d7   : > { %v1100_v42 = vpop.f32.mrb[33].mxu1 }
 0x2de   : > { %v1852_v43 = vpop.f32.mrb[34].mxu1 }
 0x2df   : > { %v2402_v44 = vpop.f32.mrb[35].mxu1 }
 0x2e6   : > { %v2404_v45 = vpop.f32.mrb[36].mxu1 }
 0x2e7   : > { %v2406_v46 = vpop.f32.mrb[37].mxu1 }
 0x2ee   : > { %v2408_v47 = vpop.f32.mrb[38].mxu1 }
 0x2ef   : > { %v2410_v48 = vpop.f32.mrb[39].mxu1 }
 0x2f6   : > { %v2412_v49 = vpop.f32.mrb[40].mxu1 }
 0x2f7   : > { %v2414_v39 = vpop.f32.mrb[41].mxu1 }
 0x2fe   : > { %v2416_v50 = vpop.f32.mrb[42].mxu1 }
 0x2ff   : > { %v2418_v51 = vpop.f32.mrb[43].mxu1 }
 0x306   : > { %v2420_v52 = vpop.f32.mrb[44].mxu1 }
 0x307   : > { %v2422_v53 = vpop.f32.mrb[45].mxu1 }
 0x30e   : > { %v2424_v54 = vpop.f32.mrb[46].mxu1 }
 0x30f   : > { %v2426_v55 = vpop.f32.mrb[47].mxu1 }
 0x34b   : > { %v1881_v56 = vpop.f32.mrb[32].mxu0 }
 0x34c   : > { %1390 = vrot.lane.b32.xlu1 %v1881_v56, %s2076_s27  ;;  %v1293_v57 = vpop.f32.mrb[33].mxu0 }
 0x34d   : > { %1388 = vrot.lane.b32.xlu0 %v1293_v57, %s2076_s27 }
 0x353   : > { %v1884_v58 = vpop.f32.mrb[34].mxu0 }
 0x354   : > { %1394 = vrot.lane.b32.xlu1 %v1884_v58, %s2076_s27  ;;  %v1303_v59 = vpop.f32.mrb[35].mxu0 }
 0x355   : > { %1392 = vrot.lane.b32.xlu0 %v1303_v59, %s2076_s27 }
 0x359   : > { %v1887_v60 = vpop.f32.mrb[36].mxu0 }
 0x35a   : > { %1398 = vrot.lane.b32.xlu1 %v1887_v60, %s2076_s27  ;;  %v1313_v61 = vpop.f32.mrb[37].mxu0 }
 0x35b   : > { %1396 = vrot.lane.b32.xlu0 %v1313_v61, %s2076_s27 }
 0x361   : > { %v1890_v62 = vpop.f32.mrb[38].mxu0 }
 0x362   : > { %1402 = vrot.lane.b32.xlu1 %v1890_v62, %s2076_s27  ;;  %v1323_v63 = vpop.f32.mrb[39].mxu0 }
 0x363   : > { %1400 = vrot.lane.b32.xlu0 %v1323_v63, %s2076_s27 }
 0x369   : > { %v1893_v0 = vpop.f32.mrb[40].mxu0 }
 0x36a   : > { %1406 = vrot.lane.b32.xlu1 %v1893_v0, %s2076_s27  ;;  %v1333_v1 = vpop.f32.mrb[41].mxu0 }
 0x36b   : > { %1404 = vrot.lane.b32.xlu0 %v1333_v1, %s2076_s27 }
 0x371   : > { %v1896_v2 = vpop.f32.mrb[48].mxu1 }
 0x372   : > { %1410 = vrot.lane.b32.xlu1 %v1896_v2, %s2076_s27  ;;  %v1343_v3 = vpop.f32.mrb[49].mxu1 }
 0x373   : > { %1408 = vrot.lane.b32.xlu0 %v1343_v3, %s2076_s27 }
 0x379   : > { %v1899_v4 = vpop.f32.mrb[50].mxu1 }
 0x37a   : > { %1414 = vrot.lane.b32.xlu1 %v1899_v4, %s2076_s27  ;;  %v1353_v5 = vpop.f32.mrb[51].mxu1 }
 0x37b   : > { %1412 = vrot.lane.b32.xlu0 %v1353_v5, %s2076_s27 }
 0x381   : > { %v1902_v6 = vpop.f32.mrb[52].mxu1 }
 0x382   : > { %1418 = vrot.lane.b32.xlu1 %v1902_v6, %s2076_s27  ;;  %v1363_v7 = vpop.f32.mrb[53].mxu1 }
 0x383   : > { %1416 = vrot.lane.b32.xlu0 %v1363_v7, %s2076_s27 }
 0x3be   : > { %v1391_v8 = vpop.permute.xlu1 %1390 }
 0x3bf   : > { %v1438_v9 = vsel %vm1436_vm2, %v1849_v41, %v1391_v8  ;;  %v1389_v10 = vpop.permute.xlu0 %1388 }
 0x3c0   : > { %1454 = vst.msk [vmem:[%s2449_s30 + $0x8] sm:$0xff] %vm985_vm1, %v1438_v9  ;;  %v1437_v11 = vsel %vm1436_vm2, %v1100_v42, %v1389_v10 }
 0x3c1   : > { %1453 = vst.msk [vmem:[%s2449_s30] sm:$0xff] %vm985_vm1, %v1437_v11 }
 0x3c6   : > { %v1395_v12 = vpop.permute.xlu1 %1394 }
 0x3c7   : > { %v1440_v13 = vsel %vm1436_vm2, %v1852_v43, %v1395_v12  ;;  %v1393_v14 = vpop.permute.xlu0 %1392 }
 0x3c8   : > { %1456 = vst.msk [vmem:[%s2449_s30 + $0x18] sm:$0xff] %vm985_vm1, %v1440_v13  ;;  %v1439_v15 = vsel %vm1436_vm2, %v2402_v44, %v1393_v14 }
 0x3c9   : > { %1455 = vst.msk [vmem:[%s2449_s30 + $0x10] sm:$0xff] %vm985_vm1, %v1439_v15 }
 0x3cc   : > { %v1399_v16 = vpop.permute.xlu1 %1398 }
 0x3cd   : > { %v1442_v17 = vsel %vm1436_vm2, %v2404_v45, %v1399_v16  ;;  %v1397_v18 = vpop.permute.xlu0 %1396 }
 0x3ce   : > { %1458 = vst.msk [vmem:[%s2449_s30 + $0x28] sm:$0xff] %vm985_vm1, %v1442_v17  ;;  %v1441_v19 = vsel %vm1436_vm2, %v2406_v46, %v1397_v18 }
 0x3cf   : > { %1457 = vst.msk [vmem:[%s2449_s30 + $0x20] sm:$0xff] %vm985_vm1, %v1441_v19 }
 0x3d4   : > { %v1403_v20 = vpop.permute.xlu1 %1402 }
 0x3d5   : > { %v1444_v21 = vsel %vm1436_vm2, %v2408_v47, %v1403_v20  ;;  %v1401_v22 = vpop.permute.xlu0 %1400 }
 0x3d6   : > { %1460 = vst.msk [vmem:[%s2449_s30 + $0x38] sm:$0xff] %vm985_vm1, %v1444_v21  ;;  %v1443_v23 = vsel %vm1436_vm2, %v2410_v48, %v1401_v22 }
 0x3d7   : > { %1459 = vst.msk [vmem:[%s2449_s30 + $0x30] sm:$0xff] %vm985_vm1, %v1443_v23 }
 0x3dc   : > { %v1407_v24 = vpop.permute.xlu1 %1406 }
 0x3dd   : > { %v1446_v25 = vsel %vm1436_vm2, %v2412_v49, %v1407_v24  ;;  %v1405_v26 = vpop.permute.xlu0 %1404 }
 0x3de   : > { %1462 = vst.msk [vmem:[%s2449_s30 + $0x48] sm:$0xff] %vm985_vm1, %v1446_v25  ;;  %v1445_v27 = vsel %vm1436_vm2, %v2414_v39, %v1405_v26 }
 0x3df   : > { %1461 = vst.msk [vmem:[%s2449_s30 + $0x40] sm:$0xff] %vm985_vm1, %v1445_v27 }
 0x3e4   : > { %v1411_v28 = vpop.permute.xlu1 %1410 }
 0x3e5   : > { %v1448_v29 = vsel %vm1436_vm2, %v2416_v50, %v1411_v28  ;;  %v1409_v30 = vpop.permute.xlu0 %1408 }
 0x3e6   : > { %1464 = vst.msk [vmem:[%s2449_s30 + $0x58] sm:$0xff] %vm985_vm1, %v1448_v29  ;;  %v1447_v31 = vsel %vm1436_vm2, %v2418_v51, %v1409_v30 }
 0x3e7   : > { %1463 = vst.msk [vmem:[%s2449_s30 + $0x50] sm:$0xff] %vm985_vm1, %v1447_v31 }
 0x3ec   : > { %v1415_v32 = vpop.permute.xlu1 %1414 }
 0x3ed   : > { %v1450_v33 = vsel %vm1436_vm2, %v2420_v52, %v1415_v32  ;;  %v1413_v34 = vpop.permute.xlu0 %1412 }
 0x3ee   : > { %1466 = vst.msk [vmem:[%s2449_s30 + $0x68] sm:$0xff] %vm985_vm1, %v1450_v33  ;;  %v1449_v35 = vsel %vm1436_vm2, %v2422_v53, %v1413_v34 }
 0x3ef   : > { %1465 = vst.msk [vmem:[%s2449_s30 + $0x60] sm:$0xff] %vm985_vm1, %v1449_v35 }
 0x3f4   : > { %v1419_v36 = vpop.permute.xlu1 %1418 }
 0x3f5   : > { %v1452_v37 = vsel %vm1436_vm2, %v2424_v54, %v1419_v36  ;;  %v1417_v38 = vpop.permute.xlu0 %1416 }
 0x3f6   : > { %1468 = vst.msk [vmem:[%s2449_s30 + $0x78] sm:$0xff] %vm985_vm1, %v1452_v37  ;;  %v1451_v40 = vsel %vm1436_vm2, %v2426_v55, %v1417_v38 }
 0x3f7   : > { %1467 = vst.msk [vmem:[%s2449_s30 + $0x70] sm:$0xff] %vm985_vm1, %v1451_v40 }
 0x3f8 PF: > { %p15_p8 = scmp.ge.s32.totalorder %s2127_s23, 4   ;;  %s2534_s18 = smov %s2062_s19 }
 0x3f9   : > { %s2535_s19 = smov %s2066_s20  ;;  %s2536_s20 = smov %s2137_s26 }
 0x3fa   : > { %s2537_s21 = smov %s2127_s23  ;;  %17 = sbr.rel (!%p15_p8) target bundleno = 3 (0x3), region = 80 }
 0x401   :  { %1491 = vsyncpa [#allocation3], 1 }
 0x402   :  { %1493 = vsyncpa [#allocation3 + $0x1], 1 }

</bundles_post_ra>
